<compile_context>
chip_gen: v6e
topology: v6e:2x2x1
jax: 0.10.0
libtpu: 0.0.40
codegen_flags: <defaults>
</compile_context>

<pallas_src>
import functools
import math

import jax
import jax.numpy as jnp
from jax.experimental import pallas as pl
from jax.experimental.pallas import tpu as pltpu


def _gelu_exact(x):
    # nn.GELU() default is the exact erf formulation.
    return 0.5 * x * (1.0 + jax.lax.erf(x * (1.0 / math.sqrt(2.0))))


def mlp_kernel(x_ref, w1t_ref, b1_ref, w2t_ref, b2_ref, o_ref, acc_ref):
    k = pl.program_id(2)

    @pl.when(k == 0)
    def _init():
        acc_ref[...] = jnp.zeros_like(acc_ref)

    # fc1 chunk: (ck, Cin) @ (Cin, tile_n) -> (ck, tile_n).
    # Native-dtype MXU operands; f32 accumulation via preferred_element_type.
    h = jnp.dot(w1t_ref[...], x_ref[...], preferred_element_type=jnp.float32)
    h = h + b1_ref[...].astype(jnp.float32)
    h = _gelu_exact(h)                 # exact erf -> matches PyTorch nn.GELU()
    # Dropout(p=0.0) is the identity -> no-op.

    # fc2 chunk: (Cout, ck) @ (ck, tile_n), accumulated over hidden chunks.
    acc_ref[...] += jnp.dot(w2t_ref[...], h.astype(w2t_ref.dtype),
                            preferred_element_type=jnp.float32)

    @pl.when(k == pl.num_programs(2) - 1)
    def _finalize():
        o_ref[...] = (acc_ref[...] + b2_ref[...].astype(jnp.float32)
                      ).astype(o_ref.dtype)


def _vmem_estimate(tile_n, ck, cin, cout, dsize):
    """Conservative VMEM working-set estimate (weights counted double-buffered)."""
    lane = 128
    xin = 2 * cin * tile_n * dsize           # double-buffered input tile
    out = 2 * cout * tile_n * dsize          # double-buffered output tile
    wgt = 2 * (ck * cin + cout * ck) * dsize  # w1^T / w2^T chunks
    bias = 2 * (ck + cout) * lane * dsize    # lane-padded bias columns
    acc = cout * tile_n * 4                  # f32 accumulator scratch
    hid = 2 * ck * tile_n * 4                # f32 hidden intermediate + slack
    return xin + out + wgt + bias + acc + hid


def _choose_tiles(hw, cin, hid, cout, dsize, lane=128, cap=2048,
                  budget=20 * 1024 * 1024):
    """Pick (tile_n, hid_chunk, hw_pad) under a VMEM budget.

    tile_n: tokens per block (lane axis).  Prefer the largest multiple of 128
    that divides H*W (no padding copy).  hid_chunk: hidden-dim chunk for the
    trailing reduction axis (Hid itself, or a multiple-of-128 divisor).
    Budget keeps the working set well inside v7x's 64 MiB VMEM.
    """
    if hw < lane:
        tile_cands = [hw]                       # full-dim block: no 128 rule
    else:
        tile_cands = [t for t in range(lane, min(hw, cap) + 1, lane)
                      if hw % t == 0]
        if not tile_cands:                      # fallback: pad the token axis
            tile_cands = [512 if hw >= 512 else lane]
    chunk_cands = [hid] + [c for c in range(lane, hid, lane) if hid % c == 0]

    for tn in sorted(tile_cands, reverse=True):
        for ck in sorted(chunk_cands, reverse=True):
            if _vmem_estimate(tn, ck, cin, cout, dsize) <= budget:
                return tn, ck, pl.cdiv(hw, tn) * tn
    tn, ck = min(tile_cands), min(chunk_cands)
    return tn, ck, pl.cdiv(hw, tn) * tn


@jax.jit
def mlp_forward(x_nchw, w1, b1, w2, b2):
    """x_nchw: (B, Cin, H, W); w1: (Cin, Hid); b1: (Hid,); w2: (Hid, Cout); b2: (Cout,)."""
    B, Cin, H, W = x_nchw.shape
    Hid = w1.shape[1]
    Cout = w2.shape[1]
    HW = H * W
    dsize = jnp.dtype(x_nchw.dtype).itemsize

    tile_n, chunk, hw_pad = _choose_tiles(HW, Cin, Hid, Cout, dsize)

    # Channel-major tokens: NCHW -> (B, C, H*W) is a free reshape.
    x_tok = x_nchw.reshape(B, Cin, HW)
    if hw_pad != HW:                 # only when no multiple-of-128 tile divides H*W
        x_tok = jnp.pad(x_tok, ((0, 0), (0, 0), (0, hw_pad - HW)))

    w1t = jnp.transpose(w1)          # (Hid, Cin)  -- tiny, one-time
    w2t = jnp.transpose(w2)          # (Cout, Hid)
    b1c = b1.reshape(Hid, 1)
    b2c = b2.reshape(Cout, 1)

    grid = (B, hw_pad // tile_n, Hid // chunk)

    cost = pl.CostEstimate(
        flops=2 * B * HW * (Cin * Hid + Hid * Cout),
        transcendentals=B * HW * Hid,
        bytes_accessed=dsize * (B * HW * (Cin + Cout)
                                + Cin * Hid + Hid * Cout + Hid + Cout),
    )
    vmem_limit = int(min(max(2 * _vmem_estimate(tile_n, chunk, Cin, Cout, dsize),
                             16 << 20), 48 << 20))

    out = pl.pallas_call(
        mlp_kernel,
        out_shape=jax.ShapeDtypeStruct((B, Cout, hw_pad), x_nchw.dtype),
        grid_spec=pltpu.PrefetchScalarGridSpec(
            num_scalar_prefetch=0,
            grid=grid,
            in_specs=[
                pl.BlockSpec((None, Cin, tile_n), lambda b, n, k: (b, 0, n)),
                pl.BlockSpec((chunk, Cin), lambda b, n, k: (k, 0)),
                pl.BlockSpec((chunk, 1), lambda b, n, k: (k, 0)),
                pl.BlockSpec((Cout, chunk), lambda b, n, k: (0, k)),
                pl.BlockSpec((Cout, 1), lambda b, n, k: (0, 0)),
            ],
            out_specs=pl.BlockSpec((None, Cout, tile_n),
                                   lambda b, n, k: (b, 0, n)),
            scratch_shapes=[pltpu.VMEM((Cout, tile_n), jnp.float32)],
        ),
        compiler_params=pltpu.CompilerParams(
            dimension_semantics=("parallel", "parallel", "arbitrary"),
            vmem_limit_bytes=vmem_limit,
        ),
        cost_estimate=cost,
    )(x_tok, w1t, b1c, w2t, b2c)

    if hw_pad != HW:
        out = out[:, :, :HW]
    return out.reshape(B, Cout, H, W)


def init_params(key, in_features, hidden_features, out_features, dtype=jnp.float32):
    """Deterministic init mimicking nn.Conv2d default (kaiming uniform + uniform bias)."""
    k1, k2, k3, k4 = jax.random.split(key, 4)
    bound1 = 1.0 / math.sqrt(in_features)
    w1 = jax.random.uniform(k1, (in_features, hidden_features), dtype,
                            minval=-bound1, maxval=bound1)
    b1 = jax.random.uniform(k2, (hidden_features,), dtype,
                            minval=-bound1, maxval=bound1)
    bound2 = 1.0 / math.sqrt(hidden_features)
    w2 = jax.random.uniform(k3, (hidden_features, out_features), dtype,
                            minval=-bound2, maxval=bound2)
    b2 = jax.random.uniform(k4, (out_features,), dtype,
                            minval=-bound2, maxval=bound2)
    return w1, b1, w2, b2


if __name__ == "__main__":
    key = jax.random.PRNGKey(0)
    kx, kp = jax.random.split(key)

    B, Cin, H, W = 2, 4, 16, 16
    hidden = 32
    Cout = Cin  # out_features defaults to in_features

    x = jax.random.normal(kx, (B, Cin, H, W), jnp.float32)
    w1, b1, w2, b2 = init_params(kp, Cin, hidden, Cout)

    out = jax.block_until_ready(mlp_forward(x, w1, b1, w2, b2))

    # Pure-JAX reference of the same math (high-precision matmuls).
    x_tok = jnp.transpose(x, (0, 2, 3, 1)).reshape(-1, Cin)
    h_ref = _gelu_exact(jnp.dot(x_tok, w1, precision=jax.lax.Precision.HIGHEST) + b1)
    y_ref = jnp.dot(h_ref, w2, precision=jax.lax.Precision.HIGHEST) + b2
    y_ref = y_ref.reshape(B, H, W, Cout).transpose(0, 3, 1, 2)

    assert out.shape == (B, Cout, H, W)
    assert jnp.allclose(out, y_ref, atol=1e-4, rtol=1e-4), \
        float(jnp.max(jnp.abs(out - y_ref)))

    print("KERNEL_OK")
</pallas_src>

<mosaic_0001>
module attributes {stable_mosaic.version = 11 : i64} {
  func.func @mlp_kernel(%arg0: i32, %arg1: i32, %arg2: i32, %arg3: memref<1x4x256xf32, #tpu.memory_space<vmem>>, %arg4: memref<32x4xf32, #tpu.memory_space<vmem>>, %arg5: memref<32x1xf32, #tpu.memory_space<vmem>>, %arg6: memref<4x32xf32, #tpu.memory_space<vmem>>, %arg7: memref<4x1xf32, #tpu.memory_space<vmem>>, %arg8: memref<1x4x256xf32, #tpu.memory_space<vmem>>, %arg9: memref<4x256xf32, #tpu.memory_space<vmem>>) attributes {dimension_semantics = [#tpu.dimension_semantics<parallel>, #tpu.dimension_semantics<parallel>, #tpu.dimension_semantics<arbitrary>], iteration_bounds = array<i64: 2, 1, 1>, scalar_prefetch = 0 : i64, scratch_operands = 1 : i64, tpu.core_type = #tpu.core_type<tc>, window_params = [{transform_indices = @transform_0, window_bounds = array<i64: 1, 4, 256>}, {transform_indices = @transform_1, window_bounds = array<i64: 32, 4>}, {transform_indices = @transform_2, window_bounds = array<i64: 32, 1>}, {transform_indices = @transform_3, window_bounds = array<i64: 4, 32>}, {pipeline_mode = #tpu.pipeline_mode<synchronous>, transform_indices = @transform_4, window_bounds = array<i64: 4, 1>}, {transform_indices = @transform_5, window_bounds = array<i64: 1, 4, 256>}]} {
    %c0_i32 = arith.constant 0 : i32
    %0 = arith.cmpi eq, %arg2, %c0_i32 : i32
    %1 = arith.extui %0 : i1 to i32
    %c0_i32_0 = arith.constant 0 : i32
    %2 = arith.cmpi ne, %1, %c0_i32_0 : i32
    scf.if %2 {
      %cst_19 = arith.constant 0.000000e+00 : f32
      %26 = vector.broadcast %cst_19 : f32 to vector<4x256xf32>
      %c0_20 = arith.constant 0 : index
      %c0_21 = arith.constant 0 : index
      %27 = vector.load %arg9[%c0_20, %c0_21] : memref<4x256xf32, #tpu.memory_space<vmem>>, vector<4x256xf32>
      tpu.vector_store %arg9[%c0_20, %c0_21], %26 {strides = array<i32>} : memref<4x256xf32, #tpu.memory_space<vmem>>, vector<4x256xf32>,
    } else {
    }
    %c0 = arith.constant 0 : index
    %c0_1 = arith.constant 0 : index
    %3 = vector.load %arg4[%c0, %c0_1] : memref<32x4xf32, #tpu.memory_space<vmem>>, vector<32x4xf32>
    %c0_2 = arith.constant 0 : index
    %c0_3 = arith.constant 0 : index
    %c0_4 = arith.constant 0 : index
    %4 = vector.load %arg3[%c0_2, %c0_3, %c0_4] : memref<1x4x256xf32, #tpu.memory_space<vmem>>, vector<1x4x256xf32>
    %5 = vector.shape_cast %4 : vector<1x4x256xf32> to vector<4x256xf32>
    %cst = arith.constant dense<0.000000e+00> : vector<32x256xf32>
    %6 = tpu.matmul %3, %5, %cst {dimension_numbers = #tpu.dot_dimension_numbers<[1], [0], [0], [1], [0, 0, 1, 1], [], []>} : vector<32x4xf32>, vector<4x256xf32>, vector<32x256xf32> -> vector<32x256xf32>
    %c0_5 = arith.constant 0 : index
    %c0_6 = arith.constant 0 : index
    %7 = vector.load %arg5[%c0_5, %c0_6] : memref<32x1xf32, #tpu.memory_space<vmem>>, vector<32x1xf32>
    %8 = vector.broadcast %7 : vector<32x1xf32> to vector<32x256xf32>
    %9 = arith.addf %6, %8 : vector<32x256xf32>
    %cst_7 = arith.constant 5.000000e-01 : f32
    %10 = vector.broadcast %cst_7 : f32 to vector<32x256xf32>
    %11 = arith.mulf %10, %9 : vector<32x256xf32>
    %cst_8 = arith.constant 0.707106769 : f32
    %12 = vector.broadcast %cst_8 : f32 to vector<32x256xf32>
    %13 = arith.mulf %9, %12 : vector<32x256xf32>
    %14 = math.erf %13 : vector<32x256xf32>
    %cst_9 = arith.constant 1.000000e+00 : f32
    %15 = vector.broadcast %cst_9 : f32 to vector<32x256xf32>
    %16 = arith.addf %15, %14 : vector<32x256xf32>
    %17 = arith.mulf %11, %16 : vector<32x256xf32>
    %c0_10 = arith.constant 0 : index
    %c0_11 = arith.constant 0 : index
    %18 = vector.load %arg9[%c0_10, %c0_11] : memref<4x256xf32, #tpu.memory_space<vmem>>, vector<4x256xf32>
    %c0_12 = arith.constant 0 : index
    %c0_13 = arith.constant 0 : index
    %19 = vector.load %arg6[%c0_12, %c0_13] : memref<4x32xf32, #tpu.memory_space<vmem>>, vector<4x32xf32>
    %cst_14 = arith.constant dense<0.000000e+00> : vector<4x256xf32>
    %20 = tpu.matmul %19, %17, %cst_14 {dimension_numbers = #tpu.dot_dimension_numbers<[1], [0], [0], [1], [0, 0, 1, 1], [], []>} : vector<4x32xf32>, vector<32x256xf32>, vector<4x256xf32> -> vector<4x256xf32>
    %21 = arith.addf %18, %20 : vector<4x256xf32>
    %c0_15 = arith.constant 0 : index
    %c0_16 = arith.constant 0 : index
    %22 = vector.load %arg9[%c0_15, %c0_16] : memref<4x256xf32, #tpu.memory_space<vmem>>, vector<4x256xf32>
    tpu.vector_store %arg9[%c0_15, %c0_16], %21 {strides = array<i32>} : memref<4x256xf32, #tpu.memory_space<vmem>>, vector<4x256xf32>,
    %c0_i32_17 = arith.constant 0 : i32
    %23 = arith.cmpi eq, %arg2, %c0_i32_17 : i32
    %24 = arith.extui %23 : i1 to i32
    %c0_i32_18 = arith.constant 0 : i32
    %25 = arith.cmpi ne, %24, %c0_i32_18 : i32
    scf.if %25 {
      %c0_19 = arith.constant 0 : index
      %c0_20 = arith.constant 0 : index
      %26 = vector.load %arg9[%c0_19, %c0_20] : memref<4x256xf32, #tpu.memory_space<vmem>>, vector<4x256xf32>
      %c0_21 = arith.constant 0 : index
      %c0_22 = arith.constant 0 : index
      %27 = vector.load %arg7[%c0_21, %c0_22] : memref<4x1xf32, #tpu.memory_space<vmem>>, vector<4x1xf32>
      %28 = vector.broadcast %27 : vector<4x1xf32> to vector<4x256xf32>
      %29 = arith.addf %26, %28 : vector<4x256xf32>
      %c0_23 = arith.constant 0 : index
      %c0_24 = arith.constant 0 : index
      %c0_25 = arith.constant 0 : index
      %30 = vector.load %arg8[%c0_23, %c0_24, %c0_25] : memref<1x4x256xf32, #tpu.memory_space<vmem>>, vector<1x4x256xf32>
      %31 = vector.shape_cast %30 : vector<1x4x256xf32> to vector<4x256xf32>
      %32 = vector.shape_cast %29 : vector<4x256xf32> to vector<1x4x256xf32>
      tpu.vector_store %arg8[%c0_23, %c0_24, %c0_25], %32 {strides = array<i32>} : memref<1x4x256xf32, #tpu.memory_space<vmem>>, vector<1x4x256xf32>,
    } else {
    }
    return
  }
  func.func @transform_0(%arg0: i32, %arg1: i32, %arg2: i32) -> (i32, i32, i32) {
    %c0_i32 = arith.constant 0 : i32
    %c0_i32_0 = arith.constant 0 : i32
    return %arg0, %c0_i32, %arg1 : i32, i32, i32
  }
  func.func @transform_1(%arg0: i32, %arg1: i32, %arg2: i32) -> (i32, i32) {
    %c0_i32 = arith.constant 0 : i32
    %c0_i32_0 = arith.constant 0 : i32
    return %arg2, %c0_i32 : i32, i32
  }
  func.func @transform_2(%arg0: i32, %arg1: i32, %arg2: i32) -> (i32, i32) {
    %c0_i32 = arith.constant 0 : i32
    %c0_i32_0 = arith.constant 0 : i32
    return %arg2, %c0_i32 : i32, i32
  }
  func.func @transform_3(%arg0: i32, %arg1: i32, %arg2: i32) -> (i32, i32) {
    %c0_i32 = arith.constant 0 : i32
    %c0_i32_0 = arith.constant 0 : i32
    return %c0_i32, %arg2 : i32, i32
  }
  func.func @transform_4(%arg0: i32, %arg1: i32, %arg2: i32) -> (i32, i32) {
    %c0_i32 = arith.constant 0 : i32
    %c0_i32_0 = arith.constant 0 : i32
    %c0_i32_1 = arith.constant 0 : i32
    return %c0_i32, %c0_i32_0 : i32, i32
  }
  func.func @transform_5(%arg0: i32, %arg1: i32, %arg2: i32) -> (i32, i32, i32) {
    %c0_i32 = arith.constant 0 : i32
    %c0_i32_0 = arith.constant 0 : i32
    return %arg0, %c0_i32, %arg1 : i32, i32, i32
  }
}

</mosaic_0001>

<bundles_post_ra>
// kernel: mlp_forward.1
= control target key start
LH: loop header
LB: loop body
LE: loop exit
PB: predicated region body
PF: predicated region fallthrough
CT: control target
= control target key end

     0   :  { %s878_s18 = smov 0   ;;  %s880_s19 = smov 0   ;;  %s948_s0 = inlined_call_operand.vmem [shape: f32[2,4,256], index: 0, kind: input, shape index: {}]   ;;  %s949_s1 = inlined_call_operand.vmem [shape: f32[32,4], index: 1, kind: input, shape index: {}]   ;;  %s950_s2 = inlined_call_operand.vmem [shape: f32[32,1], index: 2, kind: input, shape index: {}]   ;;  %s951_s3 = inlined_call_operand.vmem [shape: f32[4,32], index: 3, kind: input, shape index: {}]   ;;  %s952_s4 = inlined_call_operand.vmem [shape: f32[4,1], index: 4, kind: input, shape index: {}]   ;;  %s953_s5 = inlined_call_operand.vmem [shape: f32[2,4,256], index: 5, kind: output, shape index: {}]  }
   0x1   :  { %s882_s20 = smov 0  }
   0x2 LB: > { %s34_s21 = sadd.s32 1, %s839_s19  ;;  %p759_p0 = scmp.ge.s32.totalorder %s843_s20, 1  ;;  %s843_s20 = sphi %s882_s20, %s15_s20   ;;  %s839_s19 = sphi %s880_s19, %s955_s19   ;;  %s835_s18 = sphi %s878_s18, %s954_s18  }
   0x3   : > { %p36_p1 = scmp.ge.s32.totalorder %s34_s21, 2  ;;  %p246_p2 = scmp.lt.s32.totalorder %s843_s20, 3 }
   0x5   : > { %s957_s21 = smov (%p36_p1, %s34_s21), 0  ;;  %p247_p3 = pnand %p759_p0, %p246_p2 }
   0x6   : > { %p297_p4 = scmp.lt.s32.totalorder (!%p247_p3), %s835_s18, 1 }
   0x7   : > { %250 = sbr.rel (%p247_p3) target bundleno = 458 (0x1ca), region = 40 }
   0xc   : > { %v845_v0 = vmov 0.0   ;;  %v343_v1 = vld [vmem:[%s950_s2 + $0x8] sm:$0xff]  ;;  %s959_s18 = smov (!%p297_p4, %s835_s18), 1  ;;  %v846_v2 = vmov 0   ;;  %v345_v3 = vld [vmem:[%s950_s2 + $0x18] sm:$0xff]  ;;  %v342_v4 = vld [vmem:[%s950_s2] sm:$0xff] }
   0xd   : > { %450 = vmatprep.mubr.f32.mxu0 %v845_v0  ;;  %585 = vmatprep.mubr.f32.mxu1 %v845_v0  ;;  %s773_s26 = sshll.u32 %s959_s18, 3  ;;  %v344_v5 = vld [vmem:[%s950_s2 + $0x10] sm:$0xff]  ;;  %vm381_vm0 = vcmask 1043456   ;;  %v337_v8 = vld [vmem:[%s949_s1] sm:$0xff]  ;;  %vm368_vm1 = vcmask 31744   ;;  %v338_v10 = vld [vmem:[%s949_s1 + $0x8] sm:$0xff] }
   0xe   : > { %803 = vset.pattern.permute.xlu1 %v846_v2  ;;  %802 = vset.pattern.permute.xlu0 %v846_v2  ;;  %s304_s8 = scalar_lea.vmem %s948_s0, %s773_s26  ;;  %v602_v9 = vld [vmem:[%s952_s4] sm:$0xf]  ;;  %v339_v11 = vld [vmem:[%s949_s1 + $0x10] sm:$0xff]  ;;  %v340_v12 = vld [vmem:[%s949_s1 + $0x18] sm:$0xff]  ;;  %vm517_vm2 = vcmask 261120   ;;  %s330_s28 = scalar_lea.vmem %s953_s5, %s773_s26 }
   0xf   : > { %353 = vperm.xlu1 %803, %v343_v1   ;;  %363 = vperm.xlu0 %802, %v345_v3   ;;  %v341_v6 = vld [vmem:[%s304_s8] sm:$0xff] }
  0x10   : > { %v367_v7 = vcombine.high %v341_v6, %v341_v6 }
  0x12   : > { %764 = vmatprep.subr.msk.mxu0 %vm381_vm0, %v367_v7 }
  0x13   : > { %348 = vperm.xlu1 %803, %v342_v4   ;;  %358 = vperm.xlu0 %802, %v344_v5  }
  0x14   : > { %765 = vmatpush1.msk.msra.mxu0 %vm381_vm0, %v341_v6 }
  0x15   : > { %766 = vmatmul.mubr.msk.f32.vlgmr.msra.gmra.mxu0 %vm368_vm1, %v337_v8 }
  0x16   : > { %456 = vmatprep.mubr.f32.mxu0 %v845_v0 }
  0x17   : > { %605 = vperm.xlu0 %802, %v602_v9   ;;  %v516_v9 = vld [vmem:[%s951_s3] sm:$0xf] }
  0x19   : > { %767 = vmatmul.mubr.msk.f32.gmra.mxu0 %vm368_vm1, %v338_v10  ;;  %v847_v10 = vmov 839922192  }
  0x1a   : > { %462 = vmatprep.mubr.f32.mxu0 %v845_v0 }
  0x1d   : > { %768 = vmatmul.mubr.msk.f32.gmra.mxu0 %vm368_vm1, %v339_v11  ;;  %v608_v11 = vunpack.c.l.s4 %v847_v10 }
  0x1e   : > { %468 = vmatprep.mubr.f32.mxu0 %v845_v0 }
  0x21   : > { %769 = vmatmul.mubr.msk.f32.gmra.mxu0 %vm368_vm1, %v340_v12  ;;  %v610_v12 = vlaneseq }
  0x8a   : > { %v364_v14 = vpop.permute.xlu0 %363  ;;  %v354_v17 = vpop.permute.xlu1 %353 }
  0x8e   : > { %v359_v20 = vpop.permute.xlu0 %358  ;;  %v349_v24 = vpop.permute.xlu1 %348 }
  0xd5   : > { %v452_v13 = vpop.f32.mrf.mxu0 }
  0xd6   : > { %v453_v32 = vadd.f32 %v452_v13, %v349_v24  ;;  %v609_v13 = vunpack.c.0.s8 %v608_v11 }
  0xd7   : > { %v454_v15 = vpop.f32.mrf.mxu0 }
  0xd8   : > { %v455_v29 = vadd.f32 %v454_v15, %v349_v24  ;;  %v483_v40 = vmul.f32 0.70710677, %v453_v32  ;;  %v475_v5 = vmul.f32 0.5, %v453_v32 }
  0xd9   : > { %v458_v16 = vpop.f32.mrf.mxu0 }
  0xda   : > { %v459_v27 = vadd.f32 %v458_v16, %v354_v17  ;;  %v484_v38 = vmul.f32 0.70710677, %v455_v29  ;;  %v476_v3 = vmul.f32 0.5, %v455_v29  ;;  %v606_v16 = vpop.permute.xlu0 %605 }
  0xdb   : > { %v460_v18 = vpop.f32.mrf.mxu0 }
  0xdc   : > { %v461_v19 = vadd.f32 %v460_v18, %v354_v17  ;;  %v485_v37 = vmul.f32 0.70710677, %v459_v27  ;;  %v477_v0 = vmul.f32 0.5, %v459_v27 }
  0xdd   : > { %v464_v21 = vpop.f32.mrf.mxu0 }
  0xde   : > { %v465_v22 = vadd.f32 %v464_v21, %v359_v20  ;;  %v486_v25 = vmul.f32 0.70710677, %v461_v19  ;;  %v478_v61 = vmul.f32 0.5, %v461_v19 }
  0xdf   : > { %v466_v23 = vpop.f32.mrf.mxu0 }
  0xe0   : > { %v467_v26 = vadd.f32 %v466_v23, %v359_v20  ;;  %v487_v33 = vmul.f32 0.70710677, %v465_v22  ;;  %805 = verf.f32 %v486_v25  ;;  %v479_v58 = vmul.f32 0.5, %v465_v22 }
  0xe1   : > { %v470_v28 = vpop.f32.mrf.mxu0 }
  0xe2   : > { %v488_v30 = vmul.f32 0.70710677, %v467_v26  ;;  %v471_v31 = vadd.f32 %v470_v28, %v364_v14  ;;  %v480_v55 = vmul.f32 0.5, %v467_v26 }
  0xe3   : > { %v472_v34 = vpop.f32.mrf.mxu0 }
  0xe4   : > { %v489_v35 = vmul.f32 0.70710677, %v471_v31  ;;  %v473_v36 = vadd.f32 %v472_v34, %v364_v14  ;;  %807 = verf.f32 %v488_v30  ;;  %v481_v52 = vmul.f32 0.5, %v471_v31 }
  0xe5   : > { %v611_v14 = vshrl.u32 %v610_v12, 7 }
  0xe6   : > { %809 = verf.f32 %v489_v35  ;;  %v490_v39 = vmul.f32 0.70710677, %v473_v36  ;;  %v482_v48 = vmul.f32 0.5, %v473_v36 }
  0xe7   : > { %811 = verf.f32 %v487_v33  ;;  %v612_v15 = vsub.s32 %v609_v13, %v611_v14 }
  0xe8   : > { %813 = verf.f32 %v490_v39 }
  0xe9   : > { %815 = verf.f32 %v485_v37  ;;  %v613_v19 = vrot.slane %v606_v16, %v612_v15 }
  0xea   : > { %817 = verf.f32 %v484_v38 }
  0xeb   : > { %819 = verf.f32 %v483_v40 }
  0xed   : > { %v806_v41 = vpop.eup %805 }
  0xee   : > { %v502_v57 = vadd.f32 1.0, %v806_v41 }
  0xf0   : > { %v510_v4 = vmul.f32 %v502_v57, %v478_v61 }
  0xf1   : > { %v808_v42 = vpop.eup %807 }
  0xf2   : > { %v504_v50 = vadd.f32 1.0, %v808_v42 }
  0xf3   : > { %v810_v43 = vpop.eup %809 }
  0xf4   : > { %v812_v44 = vpop.eup %811  ;;  %v505_v46 = vadd.f32 1.0, %v810_v43  ;;  %v512_v62 = vmul.f32 %v504_v50, %v480_v55 }
  0xf5   : > { %v814_v45 = vpop.eup %813  ;;  %v503_v53 = vadd.f32 1.0, %v812_v44 }
  0xf6   : > { %v816_v47 = vpop.eup %815  ;;  %v506_v49 = vadd.f32 1.0, %v814_v45  ;;  %v513_v59 = vmul.f32 %v505_v46, %v481_v52 }
  0xf7   : > { %v818_v51 = vpop.eup %817  ;;  %v501_v60 = vadd.f32 1.0, %v816_v47  ;;  %v511_v1 = vmul.f32 %v503_v53, %v479_v58 }
  0xf8   : > { %v820_v54 = vpop.eup %819  ;;  %v514_v56 = vmul.f32 %v506_v49, %v482_v48  ;;  %v500_v63 = vadd.f32 1.0, %v818_v51 }
  0xf9   : > { %v499_v2 = vadd.f32 1.0, %v820_v54  ;;  %v509_v6 = vmul.f32 %v501_v60, %v477_v0 }
  0xfa   : > { %545 = vmatprep.subr.mxu1 %v514_v56  ;;  %v508_v7 = vmul.f32 %v500_v63, %v476_v3 }
  0xfb   : > { %546 = vmatpush1.msra.mxu1 %v513_v59  ;;  %v507_v8 = vmul.f32 %v499_v2, %v475_v5 }
  0xfc   : > { %547 = vmatprep.subr.mxu1 %v512_v62 }
  0xfd   : > { %548 = vmatpush1.msra.mxu1 %v511_v1 }
  0xfe   : > { %549 = vmatprep.subr.mxu1 %v510_v4 }
  0xff   : > { %550 = vmatpush1.msra.mxu1 %v509_v6 }
 0x100   : > { %551 = vmatprep.subr.mxu1 %v508_v7 }
 0x101   : > { %552 = vmatpush1.msra.mxu1 %v507_v8 }
 0x102   : > { %770 = vmatmul.mubr.msk.f32.vlgmr.msra.gmra.mxu1 %vm517_vm2, %v516_v9 }
 0x1c2   : > { %v587_v17 = vpop.f32.mrf.mxu1 }
 0x1c4   : > { %v589_v18 = vpop.f32.mrf.mxu1 }
 0x1c5   : > { %v594_v20 = vcombine.low %v587_v17, %v589_v18 }
 0x1c7   : > { %v615_v21 = vadd.f32 %v613_v19, %v594_v20 }
 0x1c9   : > { %616 = vst [vmem:[%s330_s28] sm:$0xff] %v615_v21 }
 0x1ca PF: > { %s15_s20 = sadd.s32 1, %s843_s20   ;;  %s954_s18 = smov %s839_s19 }
 0x1cb   : > { %p12_p5 = scmp.ge.s32.totalorder %s15_s20, 4   ;;  %s955_s19 = smov %s957_s21 }
 0x1cd   :  { %14 = sbr.rel (!%p12_p5) target bundleno = 2 (0x2), region = 87 }

</bundles_post_ra>
